<compile_context>
chip_gen: v7x
topology: tpu7x:2x2x1
jax: 0.10.0
libtpu: 0.0.40
codegen_flags: <defaults>
</compile_context>

<pallas_src>
import functools

import jax
import jax.numpy as jnp
from jax.experimental import pallas as pl
from jax.experimental.pallas import tpu as pltpu

LANE = 128
SUBLANE = 8


def _round_up(x, m):
    return (x + m - 1) // m * m


def _dqn_dueling_kernel(x_ref, w_in_ref, b_in_ref, w_h1_ref, b_h1_ref,
                        w_q_ref, b_q_ref, q_ref):
    # Feature extractor: relu(x @ W_in + b_in) -> (TB, 128), f32 accumulation.
    h = jnp.dot(x_ref[...], w_in_ref[...], preferred_element_type=jnp.float32)
    h = jnp.maximum(h + b_in_ref[...], 0.0)

    # Fused value/advantage hidden layer: relu(h @ [Wv1 | Wa1] + [bv1 | ba1]).
    z = jnp.dot(h.astype(w_h1_ref.dtype), w_h1_ref[...],
                preferred_element_type=jnp.float32)
    z = jnp.maximum(z + b_h1_ref[...], 0.0)

    # Fused heads + dueling combine folded into one lane-dense matmul.
    q = jnp.dot(z.astype(w_q_ref.dtype), w_q_ref[...],
                preferred_element_type=jnp.float32)
    q_ref[...] = (q + b_q_ref[...]).astype(q_ref.dtype)


@functools.partial(jax.jit, static_argnames=("block_batch", "compute_dtype"))
def dqn_dueling_forward(x, params, *, block_batch=512,
                        compute_dtype=jnp.float32):
    batch, obs_dim = x.shape
    feat = params["w_in"].shape[1]            # 128
    hidden = params["w_v1"].shape[1]
    action = params["w_a2"].shape[1]
    cdt = jnp.dtype(compute_dtype)

    # --- trace-time algebraic fusion of both heads + dueling combine ---
    w_h1 = jnp.concatenate([params["w_v1"], params["w_a1"]], axis=1)    # (F, 2H)
    b_h1 = jnp.concatenate([params["b_v1"], params["b_a1"]], axis=1)    # (1, 2H)
    combine = jnp.eye(action, dtype=jnp.float32) - 1.0 / action         # (A, A)
    w_q = jnp.concatenate(
        [params["w_v2"] @ jnp.ones((1, action), jnp.float32),           # value broadcast
         params["w_a2"] @ combine], axis=0)                             # advantage - mean
    b_q = params["b_v2"] + (params["b_a2"] - jnp.mean(params["b_a2"]))  # (1, A)

    # --- lane-dense zero padding (unmasked stores / full MXU result pops) ---
    hp = _round_up(2 * hidden, LANE)
    ap = _round_up(action, LANE)
    w_h1 = jnp.pad(w_h1, ((0, 0), (0, hp - 2 * hidden)))
    b_h1 = jnp.pad(b_h1, ((0, 0), (0, hp - 2 * hidden)))
    w_q = jnp.pad(w_q, ((0, hp - 2 * hidden), (0, ap - action)))
    b_q = jnp.pad(b_q, ((0, 0), (0, ap - action)))

    # --- batch tiling (TB multiple of 8, batch padded up to a whole grid) ---
    tb = min(block_batch, _round_up(batch, SUBLANE))
    padded_batch = _round_up(batch, tb)
    x_p = jnp.pad(x, ((0, padded_batch - batch), (0, 0))).astype(cdt)

    w_in = params["w_in"].astype(cdt)
    w_h1 = w_h1.astype(cdt)
    w_q = w_q.astype(cdt)
    b_in = params["b_in"].astype(jnp.float32)
    b_h1 = b_h1.astype(jnp.float32)
    b_q = b_q.astype(jnp.float32)

    const = lambda i: (0, 0)  # weights resident in VMEM across all batch tiles

    q_padded = pl.pallas_call(
        _dqn_dueling_kernel,
        out_shape=jax.ShapeDtypeStruct((padded_batch, ap), jnp.float32),
        grid=(padded_batch // tb,),
        in_specs=[
            pl.BlockSpec((tb, obs_dim), lambda i: (i, 0)),   # streamed x tile
            pl.BlockSpec((obs_dim, feat), const),
            pl.BlockSpec((1, feat), const),
            pl.BlockSpec((feat, hp), const),
            pl.BlockSpec((1, hp), const),
            pl.BlockSpec((hp, ap), const),
            pl.BlockSpec((1, ap), const),
        ],
        out_specs=pl.BlockSpec((tb, ap), lambda i: (i, 0)),  # streamed q tile
        compiler_params=pltpu.CompilerParams(
            dimension_semantics=("parallel",),               # v7x: both TCs
            vmem_limit_bytes=32 * 1024 * 1024),
    )(x_p, w_in, b_in, w_h1, b_h1, w_q, b_q)

    return q_padded[:batch, :action]


def init_params(key, obs_dim, action_size, hidden_units, feature_size=128):
    """Deterministic nn.Linear-style init: U(-1/sqrt(fan_in), 1/sqrt(fan_in)).

    Weights stored as (in_features, out_features) = PyTorch weight.T.
    """
    def linear(key, fan_in, fan_out):
        kw, kb = jax.random.split(key)
        bound = 1.0 / jnp.sqrt(jnp.float32(fan_in))
        w = jax.random.uniform(kw, (fan_in, fan_out), jnp.float32, -bound, bound)
        b = jax.random.uniform(kb, (1, fan_out), jnp.float32, -bound, bound)
        return w, b

    keys = jax.random.split(key, 5)
    w_in, b_in = linear(keys[0], obs_dim, feature_size)
    w_v1, b_v1 = linear(keys[1], feature_size, hidden_units)
    w_v2, b_v2 = linear(keys[2], hidden_units, 1)
    w_a1, b_a1 = linear(keys[3], feature_size, hidden_units)
    w_a2, b_a2 = linear(keys[4], hidden_units, action_size)
    return dict(w_in=w_in, b_in=b_in,
                w_v1=w_v1, b_v1=b_v1, w_v2=w_v2, b_v2=b_v2,
                w_a1=w_a1, b_a1=b_a1, w_a2=w_a2, b_a2=b_a2)


def reference_forward(x, p):
    h = jax.nn.relu(x @ p["w_in"] + p["b_in"])
    v = jax.nn.relu(h @ p["w_v1"] + p["b_v1"]) @ p["w_v2"] + p["b_v2"]
    a = jax.nn.relu(h @ p["w_a1"] + p["b_a1"]) @ p["w_a2"] + p["b_a2"]
    return v + (a - jnp.mean(a, axis=1, keepdims=True))


if __name__ == "__main__":
    # observation_size = (8,) -> dense path; action_size = 4; hidden_units = 32
    obs_dim, action_size, hidden_units = 8, 4, 32
    key = jax.random.PRNGKey(0)
    k_x, k_p = jax.random.split(key)
    params = init_params(k_p, obs_dim, action_size, hidden_units)

    # Small correctness check (f32 operands).
    batch = 2
    x = jax.random.normal(k_x, (batch, obs_dim), dtype=jnp.float32)
    q = jax.block_until_ready(
        dqn_dueling_forward(x, params, compute_dtype=jnp.float32))
    q_ref = reference_forward(x, params)
    assert q.shape == (batch, action_size)
    assert jnp.allclose(q, q_ref, atol=1e-4, rtol=1e-4), (q, q_ref)

    # Multi-tile grid path (exercises streaming / pipelining), f32 operands.
    batch2 = 48
    x2 = jax.random.normal(jax.random.PRNGKey(1), (batch2, obs_dim), jnp.float32)
    q2 = jax.block_until_ready(
        dqn_dueling_forward(x2, params, block_batch=16,
                            compute_dtype=jnp.float32))
    assert jnp.allclose(q2, reference_forward(x2, params), atol=1e-4, rtol=1e-4)

    # bf16-operand fast path (MXU-native on v5e/v6e/v7x), looser tolerance.
    q2_bf16 = jax.block_until_ready(
        dqn_dueling_forward(x2, params, block_batch=16,
                            compute_dtype=jnp.bfloat16))
    assert jnp.allclose(q2_bf16, reference_forward(x2, params),
                        atol=3e-2, rtol=3e-2)

    print("KERNEL_OK")
</pallas_src>

<mosaic_0001>
module attributes {stable_mosaic.version = 11 : i64} {
  func.func @_dqn_dueling_kernel(%arg0: i32, %arg1: memref<8x8xf32, #tpu.memory_space<vmem>>, %arg2: memref<8x128xf32, #tpu.memory_space<vmem>>, %arg3: memref<1x128xf32, #tpu.memory_space<vmem>>, %arg4: memref<128x128xf32, #tpu.memory_space<vmem>>, %arg5: memref<1x128xf32, #tpu.memory_space<vmem>>, %arg6: memref<128x128xf32, #tpu.memory_space<vmem>>, %arg7: memref<1x128xf32, #tpu.memory_space<vmem>>, %arg8: memref<8x128xf32, #tpu.memory_space<vmem>>) attributes {dimension_semantics = [#tpu.dimension_semantics<parallel>], iteration_bounds = array<i64: 1>, scalar_prefetch = 0 : i64, scratch_operands = 0 : i64, tpu.core_type = #tpu.core_type<tc>, window_params = [{transform_indices = @transform_0, window_bounds = array<i64: 8, 8>}, {pipeline_mode = #tpu.pipeline_mode<synchronous>, transform_indices = @transform_1, window_bounds = array<i64: 8, 128>}, {pipeline_mode = #tpu.pipeline_mode<synchronous>, transform_indices = @transform_2, window_bounds = array<i64: 1, 128>}, {pipeline_mode = #tpu.pipeline_mode<synchronous>, transform_indices = @transform_3, window_bounds = array<i64: 128, 128>}, {pipeline_mode = #tpu.pipeline_mode<synchronous>, transform_indices = @transform_4, window_bounds = array<i64: 1, 128>}, {pipeline_mode = #tpu.pipeline_mode<synchronous>, transform_indices = @transform_5, window_bounds = array<i64: 128, 128>}, {pipeline_mode = #tpu.pipeline_mode<synchronous>, transform_indices = @transform_6, window_bounds = array<i64: 1, 128>}, {transform_indices = @transform_7, window_bounds = array<i64: 8, 128>}]} {
    %c0 = arith.constant 0 : index
    %c0_0 = arith.constant 0 : index
    %0 = vector.load %arg1[%c0, %c0_0] : memref<8x8xf32, #tpu.memory_space<vmem>>, vector<8x8xf32>
    %c0_1 = arith.constant 0 : index
    %c0_2 = arith.constant 0 : index
    %1 = vector.load %arg2[%c0_1, %c0_2] : memref<8x128xf32, #tpu.memory_space<vmem>>, vector<8x128xf32>
    %cst = arith.constant dense<0.000000e+00> : vector<8x128xf32>
    %2 = tpu.matmul %0, %1, %cst {dimension_numbers = #tpu.dot_dimension_numbers<[1], [0], [0], [1], [0, 0, 1, 1], [], []>} : vector<8x8xf32>, vector<8x128xf32>, vector<8x128xf32> -> vector<8x128xf32>
    %c0_3 = arith.constant 0 : index
    %c0_4 = arith.constant 0 : index
    %3 = vector.load %arg3[%c0_3, %c0_4] : memref<1x128xf32, #tpu.memory_space<vmem>>, vector<1x128xf32>
    %4 = vector.broadcast %3 : vector<1x128xf32> to vector<8x128xf32>
    %5 = arith.addf %2, %4 : vector<8x128xf32>
    %cst_5 = arith.constant 0.000000e+00 : f32
    %6 = vector.broadcast %cst_5 : f32 to vector<8x128xf32>
    %7 = arith.maximumf %5, %6 : vector<8x128xf32>
    %c0_6 = arith.constant 0 : index
    %c0_7 = arith.constant 0 : index
    %8 = vector.load %arg4[%c0_6, %c0_7] : memref<128x128xf32, #tpu.memory_space<vmem>>, vector<128x128xf32>
    %cst_8 = arith.constant dense<0.000000e+00> : vector<8x128xf32>
    %9 = tpu.matmul %7, %8, %cst_8 {dimension_numbers = #tpu.dot_dimension_numbers<[1], [0], [0], [1], [0, 0, 1, 1], [], []>} : vector<8x128xf32>, vector<128x128xf32>, vector<8x128xf32> -> vector<8x128xf32>
    %c0_9 = arith.constant 0 : index
    %c0_10 = arith.constant 0 : index
    %10 = vector.load %arg5[%c0_9, %c0_10] : memref<1x128xf32, #tpu.memory_space<vmem>>, vector<1x128xf32>
    %11 = vector.broadcast %10 : vector<1x128xf32> to vector<8x128xf32>
    %12 = arith.addf %9, %11 : vector<8x128xf32>
    %cst_11 = arith.constant 0.000000e+00 : f32
    %13 = vector.broadcast %cst_11 : f32 to vector<8x128xf32>
    %14 = arith.maximumf %12, %13 : vector<8x128xf32>
    %c0_12 = arith.constant 0 : index
    %c0_13 = arith.constant 0 : index
    %15 = vector.load %arg6[%c0_12, %c0_13] : memref<128x128xf32, #tpu.memory_space<vmem>>, vector<128x128xf32>
    %cst_14 = arith.constant dense<0.000000e+00> : vector<8x128xf32>
    %16 = tpu.matmul %14, %15, %cst_14 {dimension_numbers = #tpu.dot_dimension_numbers<[1], [0], [0], [1], [0, 0, 1, 1], [], []>} : vector<8x128xf32>, vector<128x128xf32>, vector<8x128xf32> -> vector<8x128xf32>
    %c0_15 = arith.constant 0 : index
    %c0_16 = arith.constant 0 : index
    %17 = vector.load %arg7[%c0_15, %c0_16] : memref<1x128xf32, #tpu.memory_space<vmem>>, vector<1x128xf32>
    %18 = vector.broadcast %17 : vector<1x128xf32> to vector<8x128xf32>
    %19 = arith.addf %16, %18 : vector<8x128xf32>
    %c0_17 = arith.constant 0 : index
    %c0_18 = arith.constant 0 : index
    %20 = vector.load %arg8[%c0_17, %c0_18] : memref<8x128xf32, #tpu.memory_space<vmem>>, vector<8x128xf32>
    tpu.vector_store %arg8[%c0_17, %c0_18], %19 {strides = array<i32>} : memref<8x128xf32, #tpu.memory_space<vmem>>, vector<8x128xf32>,
    return
  }
  func.func @transform_0(%arg0: i32) -> (i32, i32) {
    %c0_i32 = arith.constant 0 : i32
    %c0_i32_0 = arith.constant 0 : i32
    return %arg0, %c0_i32 : i32, i32
  }
  func.func @transform_1(%arg0: i32) -> (i32, i32) {
    %c0_i32 = arith.constant 0 : i32
    %c0_i32_0 = arith.constant 0 : i32
    %c0_i32_1 = arith.constant 0 : i32
    return %c0_i32, %c0_i32_0 : i32, i32
  }
  func.func @transform_2(%arg0: i32) -> (i32, i32) {
    %c0_i32 = arith.constant 0 : i32
    %c0_i32_0 = arith.constant 0 : i32
    %c0_i32_1 = arith.constant 0 : i32
    return %c0_i32, %c0_i32_0 : i32, i32
  }
  func.func @transform_3(%arg0: i32) -> (i32, i32) {
    %c0_i32 = arith.constant 0 : i32
    %c0_i32_0 = arith.constant 0 : i32
    %c0_i32_1 = arith.constant 0 : i32
    return %c0_i32, %c0_i32_0 : i32, i32
  }
  func.func @transform_4(%arg0: i32) -> (i32, i32) {
    %c0_i32 = arith.constant 0 : i32
    %c0_i32_0 = arith.constant 0 : i32
    %c0_i32_1 = arith.constant 0 : i32
    return %c0_i32, %c0_i32_0 : i32, i32
  }
  func.func @transform_5(%arg0: i32) -> (i32, i32) {
    %c0_i32 = arith.constant 0 : i32
    %c0_i32_0 = arith.constant 0 : i32
    %c0_i32_1 = arith.constant 0 : i32
    return %c0_i32, %c0_i32_0 : i32, i32
  }
  func.func @transform_6(%arg0: i32) -> (i32, i32) {
    %c0_i32 = arith.constant 0 : i32
    %c0_i32_0 = arith.constant 0 : i32
    %c0_i32_1 = arith.constant 0 : i32
    return %c0_i32, %c0_i32_0 : i32, i32
  }
  func.func @transform_7(%arg0: i32) -> (i32, i32) {
    %c0_i32 = arith.constant 0 : i32
    %c0_i32_0 = arith.constant 0 : i32
    return %arg0, %c0_i32 : i32, i32
  }
}

</mosaic_0001>

<bundles_post_ra>
// kernel: dqn_dueling_forward.1
= control target key start
LH: loop header
LB: loop body
LE: loop exit
PB: predicated region body
PF: predicated region fallthrough
CT: control target
= control target key end

     0   :  { %vm35_vm0 = vcmask 64512   ;;  %v468_v0 = vmov 0.0   ;;  %vm469_vm1 = vmmov 0   ;;  %v470_v4 = vmov 0.0|0.0   ;;  %s641_s1 = inlined_call_operand.vmem [shape: f32[8,128], index: 1, kind: input, shape index: {}]   ;;  %s642_s0 = inlined_call_operand.vmem [shape: f32[8,8], index: 0, kind: input, shape index: {}]   ;;  %s643_s3 = inlined_call_operand.vmem [shape: f32[128,128], index: 3, kind: input, shape index: {}]   ;;  %s644_s5 = inlined_call_operand.vmem [shape: f32[128,128], index: 5, kind: input, shape index: {}]   ;;  %s645_s2 = inlined_call_operand.vmem [shape: f32[1,128], index: 2, kind: input, shape index: {}]   ;;  %s646_s4 = inlined_call_operand.vmem [shape: f32[1,128], index: 4, kind: input, shape index: {}]   ;;  %s647_s6 = inlined_call_operand.vmem [shape: f32[1,128], index: 6, kind: input, shape index: {}]   ;;  %s648_s7 = inlined_call_operand.vmem [shape: f32[8,128], index: 7, kind: output, shape index: {}]  }
   0x1   :  { %342 = vmatprep.subr.mxu0 %v468_v0  ;;  %v27_v1 = vld [vmem:[%s641_s1] sm:$0xff]  ;;  %344 = vmatprep.mubr.msk.f32.mxu0 %vm469_vm1, %v468_v0  ;;  %v111_v5 = vld [vmem:[%s643_s3 + $0x8] sm:$0xff]  ;;  %v112_v6 = vld [vmem:[%s643_s3 + $0x10] sm:$0xff] }
   0x2   :  { %v26_v2 = vld [vmem:[%s642_s0] sm:$0xff]  ;;  %343 = vmatpush3.msra.mxu0 %v27_v1  ;;  %417 = vmatprep.subr.bf16.mxu1 %v470_v4  ;;  %v113_v7 = vld [vmem:[%s643_s3 + $0x18] sm:$0xff]  ;;  %v115_v11 = vld [vmem:[%s643_s3 + $0x28] sm:$0xff] }
   0x3   :  { %v110_v3 = vld [vmem:[%s643_s3] sm:$0xff]  ;;  %345 = vmatmul.mubr.msk.f32.vlgmr.msra.gmra.mrb[0].mxu0 %vm35_vm0, %v26_v2  ;;  %379 = vmatprep.mubr.msk.f32.mxu1 %vm469_vm1, %v468_v0  ;;  %v421_v9 = vpack.c.bf16 %v113_v7, %v112_v6  ;;  %v116_v13 = vld [vmem:[%s643_s3 + $0x30] sm:$0xff]  ;;  %v117_v14 = vld [vmem:[%s643_s3 + $0x38] sm:$0xff] }
   0x4   :  { %v418_v8 = vpack.c.bf16 %v111_v5, %v110_v3  ;;  %441 = vmatprep.subr.bf16.mxu0 %v470_v4  ;;  %414 = vmatprep.mubr.msk.f32.mxu0 %vm469_vm1, %v468_v0  ;;  %v114_v10 = vld [vmem:[%s643_s3 + $0x20] sm:$0xff]  ;;  %v427_v15 = vpack.c.bf16 %v117_v14, %v116_v13  ;;  %v119_v17 = vld [vmem:[%s643_s3 + $0x48] sm:$0xff]  ;;  %v120_v19 = vld [vmem:[%s643_s3 + $0x50] sm:$0xff] }
   0x5   :  { %v424_v12 = vpack.c.bf16 %v115_v11, %v114_v10  ;;  %v118_v16 = vld [vmem:[%s643_s3 + $0x40] sm:$0xff]  ;;  %v121_v20 = vld [vmem:[%s643_s3 + $0x58] sm:$0xff]  ;;  %v123_v23 = vld [vmem:[%s643_s3 + $0x68] sm:$0xff] }
   0x6   :  { %419 = vmatpush3.bf16.msra.mxu1 %v418_v8  ;;  %v430_v18 = vpack.c.bf16 %v119_v17, %v118_v16  ;;  %v433_v21 = vpack.c.bf16 %v121_v20, %v120_v19  ;;  %v122_v22 = vld [vmem:[%s643_s3 + $0x60] sm:$0xff]  ;;  %v124_v25 = vld [vmem:[%s643_s3 + $0x70] sm:$0xff]  ;;  %v125_v26 = vld [vmem:[%s643_s3 + $0x78] sm:$0xff] }
   0x7   :  { %420 = vmatprep.subr.bf16.mxu1 %v470_v4  ;;  %v436_v24 = vpack.c.bf16 %v123_v23, %v122_v22  ;;  %v439_v27 = vpack.c.bf16 %v125_v26, %v124_v25  ;;  %v204_v28 = vld [vmem:[%s644_s5] sm:$0xff]  ;;  %v205_v29 = vld [vmem:[%s644_s5 + $0x8] sm:$0xff]  ;;  %v206_v30 = vld [vmem:[%s644_s5 + $0x10] sm:$0xff] }
   0x8   :  { %v442_v31 = vpack.c.bf16 %v205_v29, %v204_v28  ;;  %v207_v32 = vld [vmem:[%s644_s5 + $0x18] sm:$0xff]  ;;  %v208_v34 = vld [vmem:[%s644_s5 + $0x20] sm:$0xff]  ;;  %v209_v35 = vld [vmem:[%s644_s5 + $0x28] sm:$0xff] }
   0x9   :  { %v445_v33 = vpack.c.bf16 %v207_v32, %v206_v30  ;;  %v448_v36 = vpack.c.bf16 %v209_v35, %v208_v34  ;;  %v210_v37 = vld [vmem:[%s644_s5 + $0x30] sm:$0xff]  ;;  %v211_v38 = vld [vmem:[%s644_s5 + $0x38] sm:$0xff]  ;;  %v212_v40 = vld [vmem:[%s644_s5 + $0x40] sm:$0xff] }
   0xa   :  { %422 = vmatpush3.bf16.msra.mxu1 %v421_v9  ;;  %443 = vmatpush3.bf16.msra.mxu0 %v442_v31  ;;  %v451_v39 = vpack.c.bf16 %v211_v38, %v210_v37  ;;  %v213_v41 = vld [vmem:[%s644_s5 + $0x48] sm:$0xff]  ;;  %v214_v43 = vld [vmem:[%s644_s5 + $0x50] sm:$0xff]  ;;  %v215_v44 = vld [vmem:[%s644_s5 + $0x58] sm:$0xff] }
   0xb   :  { %423 = vmatprep.subr.bf16.mxu1 %v470_v4  ;;  %444 = vmatprep.subr.bf16.mxu0 %v470_v4  ;;  %v454_v42 = vpack.c.bf16 %v213_v41, %v212_v40  ;;  %v457_v45 = vpack.c.bf16 %v215_v44, %v214_v43  ;;  %v216_v46 = vld [vmem:[%s644_s5 + $0x60] sm:$0xff]  ;;  %v217_v47 = vld [vmem:[%s644_s5 + $0x68] sm:$0xff]  ;;  %v218_v54 = vld [vmem:[%s644_s5 + $0x70] sm:$0xff] }
   0xc   :  { %v460_v48 = vpack.c.bf16 %v217_v47, %v216_v46  ;;  %v302_v49 = vld [vmem:[%s645_s2] ss:$0 sm:$0xff]  ;;  %v219_v55 = vld [vmem:[%s644_s5 + $0x78] sm:$0xff] }
   0xd   :  { %v463_v56 = vpack.c.bf16 %v219_v55, %v218_v54  ;;  %v304_v57 = vld [vmem:[%s646_s4] ss:$0 sm:$0xff] }
   0xe   :  { %425 = vmatpush3.bf16.msra.mxu1 %v424_v12  ;;  %446 = vmatpush3.bf16.msra.mxu0 %v445_v33  ;;  %v305_v62 = vld [vmem:[%s647_s6] ss:$0 sm:$0xff] }
   0xf   :  { %426 = vmatprep.subr.bf16.mxu1 %v470_v4  ;;  %447 = vmatprep.subr.bf16.mxu0 %v470_v4 }
  0x12   :  { %428 = vmatpush3.bf16.msra.mxu1 %v427_v15  ;;  %449 = vmatpush3.bf16.msra.mxu0 %v448_v36 }
  0x13   :  { %429 = vmatprep.subr.bf16.mxu1 %v470_v4  ;;  %450 = vmatprep.subr.bf16.mxu0 %v470_v4 }
  0x16   :  { %431 = vmatpush3.bf16.msra.mxu1 %v430_v18  ;;  %452 = vmatpush3.bf16.msra.mxu0 %v451_v39 }
  0x17   :  { %432 = vmatprep.subr.bf16.mxu1 %v470_v4  ;;  %453 = vmatprep.subr.bf16.mxu0 %v470_v4 }
  0x1a   :  { %434 = vmatpush3.bf16.msra.mxu1 %v433_v21  ;;  %455 = vmatpush3.bf16.msra.mxu0 %v454_v42 }
  0x1b   :  { %435 = vmatprep.subr.bf16.mxu1 %v470_v4  ;;  %456 = vmatprep.subr.bf16.mxu0 %v470_v4 }
  0x1e   :  { %437 = vmatpush3.bf16.msra.mxu1 %v436_v24  ;;  %458 = vmatpush3.bf16.msra.mxu0 %v457_v45 }
  0x1f   :  { %438 = vmatprep.subr.bf16.mxu1 %v470_v4  ;;  %459 = vmatprep.subr.bf16.mxu0 %v470_v4 }
  0x22   :  { %440 = vmatpush3.bf16.msra.mxu1 %v439_v27  ;;  %461 = vmatpush3.bf16.msra.mxu0 %v460_v48 }
  0x23   :  { %462 = vmatprep.subr.bf16.mxu0 %v470_v4 }
  0x26   :  { %464 = vmatpush3.bf16.msra.mxu0 %v463_v56 }
  0xd6   :  { %v105_v50 = vpop.f32.mrb[0].mxu0 }
  0xd7   :  { %v106_v51 = vadd.f32 %v302_v49, %v105_v50  ;;  %v346_v52 = vpop.f32.mrb[1].mxu0 }
  0xd9   :  { %v109_v53 = vmax.f32 %v106_v51, 0.0 }
  0xdb   :  { %380 = vmatmul.mubr.f32.vlgmr.msra.gmra.mrb[0].mxu1 %v109_v53 }
 0x1ae   :  { %v199_v58 = vpop.f32.mrb[0].mxu1 }
 0x1af   :  { %v200_v59 = vadd.f32 %v304_v57, %v199_v58  ;;  %v381_v60 = vpop.f32.mrb[1].mxu1 }
 0x1b1   :  { %v203_v61 = vmax.f32 %v200_v59, 0.0 }
 0x1b3   :  { %415 = vmatmul.mubr.f32.vlgmr.msra.gmra.mrb[2].mxu0 %v203_v61 }
 0x286   :  { %v293_v63 = vpop.f32.mrb[2].mxu0 }
 0x287   :  { %v294_v0 = vadd.f32 %v305_v62, %v293_v63  ;;  %v416_v1 = vpop.f32.mrb[3].mxu0 }
 0x289   :  { %297 = vst [vmem:[%s648_s7] sm:$0xff] %v294_v0 }

</bundles_post_ra>
